<compile_context>
chip_gen: v6e
topology: v6e:2x2x1
jax: 0.10.0
libtpu: 0.0.40
codegen_flags: <defaults>
</compile_context>

<pallas_src>
import functools
import numpy as np

import jax
import jax.numpy as jnp
from jax.experimental import pallas as pl
from jax.experimental.pallas import tpu as pltpu

_VMEM_LIMIT = 48 * 1024 * 1024   # under v7x's 64 MiB/core; plenty of headroom on v5e/v6e.


def _round_up(n, m):
    return ((n + m - 1) // m) * m


def _cparams(**kw):
    return pltpu.CompilerParams(vmem_limit_bytes=_VMEM_LIMIT, **kw)


# ----------------------------------------------------------------------------
# In-kernel building blocks (called inside Pallas kernel bodies)
# ----------------------------------------------------------------------------

def _bc1x1(t, w_ref, s_ref, h_ref):
    """BasicConv2d 1x1: relu((t @ w) * scale + shift); bf16 operands, f32 math, bf16 out."""
    acc = jnp.dot(t, w_ref[...], preferred_element_type=jnp.float32)
    return jnp.maximum(acc * s_ref[...] + h_ref[...], 0.0).astype(jnp.bfloat16)


def _tap_conv(t, staps_ref, w_ref):
    """Spatial conv as a sum over taps.  staps_ref[k] is a one-hot (Mout, Min) row-selection
    matrix (all-zero rows where that tap falls into the zero padding), w_ref is (T, Cin, Cout)."""
    acc = None
    for k in range(w_ref.shape[0]):
        shifted = jnp.dot(staps_ref[k], t,
                          preferred_element_type=jnp.float32).astype(jnp.bfloat16)
        p = jnp.dot(shifted, w_ref[k], preferred_element_type=jnp.float32)
        acc = p if acc is None else acc + p
    return acc


def _bconv(t, staps_ref, w_ref, s_ref, h_ref):
    """BasicConv2d (spatial): relu(conv(t) * scale + shift)."""
    acc = _tap_conv(t, staps_ref, w_ref)
    return jnp.maximum(acc * s_ref[...] + h_ref[...], 0.0).astype(jnp.bfloat16)


def _tap_maxpool(xb, staps_ref):
    """Max pool over a valid (unpadded) window: every tap selects exactly one input row."""
    m = None
    for k in range(staps_ref.shape[0]):
        sel = jnp.dot(staps_ref[k], xb, preferred_element_type=jnp.float32)
        m = sel if m is None else jnp.maximum(m, sel)
    return m


# ----------------------------------------------------------------------------
# Pallas kernels
# ----------------------------------------------------------------------------

def _mm_bn_act_kernel(x_ref, w_ref, s_ref, b_ref, o_ref, *, relu):
    """o = act((x @ w) * scale + shift); bf16 operands, f32 accumulate / epilogue."""
    acc = jnp.dot(x_ref[...], w_ref[...], preferred_element_type=jnp.float32)
    y = acc * s_ref[...] + b_ref[...]
    if relu:
        y = jnp.maximum(y, 0.0)
    o_ref[...] = y.astype(o_ref.dtype)


def _max_window_kernel(s_ref, o_ref):
    """Max over the leading (window-tap) axis of a stacked-slices block."""
    o_ref[...] = jnp.max(s_ref[...], axis=0).astype(o_ref.dtype)


def _block35_kernel(x_ref, s9_ref,
                    w0, s0, h0,
                    w10, s10, h10, w11, s11, h11,
                    w20, s20, h20, w21, s21, h21, w22, s22, h22,
                    wp0, wp1, wp2, bp,
                    o_ref, *, scale, relu):
    """Whole Block35 (3 branches, 3x3 convs, 1x1 projection, residual merge) in one kernel."""
    x = x_ref[...].astype(jnp.float32)            # residual trunk, f32
    xb = x.astype(jnp.bfloat16)
    b0 = _bc1x1(xb, w0, s0, h0)                               # (M, 32)
    b1 = _bc1x1(xb, w10, s10, h10)
    b1 = _bconv(b1, s9_ref, w11, s11, h11)                    # (M, 32)
    b2 = _bc1x1(xb, w20, s20, h20)
    b2 = _bconv(b2, s9_ref, w21, s21, h21)                    # (M, 48)
    b2 = _bconv(b2, s9_ref, w22, s22, h22)                    # (M, 64)
    # 1x1 projection of the (virtual) channel concat, weight pre-split per branch.
    proj = (jnp.dot(b0, wp0[...], preferred_element_type=jnp.float32)
            + jnp.dot(b1, wp1[...], preferred_element_type=jnp.float32)
            + jnp.dot(b2, wp2[...], preferred_element_type=jnp.float32)
            + bp[...])
    y = proj * scale + x
    if relu:
        y = jnp.maximum(y, 0.0)
    o_ref[...] = y.astype(o_ref.dtype)


def _block2_kernel(x_ref, sa_ref, sb_ref,
                   w0, s0, h0,
                   w10, s10, h10, w11, s11, h11, w12, s12, h12,
                   wp0, wp1, bp,
                   o_ref, *, scale, relu):
    """Block17 / Block8 (2 branches, two asymmetric convs, projection, residual merge)."""
    x = x_ref[...].astype(jnp.float32)
    xb = x.astype(jnp.bfloat16)
    b0 = _bc1x1(xb, w0, s0, h0)
    b1 = _bc1x1(xb, w10, s10, h10)
    b1 = _bconv(b1, sa_ref, w11, s11, h11)        # (1,7) / (1,3)
    b1 = _bconv(b1, sb_ref, w12, s12, h12)        # (7,1) / (3,1)
    proj = (jnp.dot(b0, wp0[...], preferred_element_type=jnp.float32)
            + jnp.dot(b1, wp1[...], preferred_element_type=jnp.float32)
            + bp[...])
    y = proj * scale + x
    if relu:
        y = jnp.maximum(y, 0.0)
    o_ref[...] = y.astype(o_ref.dtype)


def _mixed5b_kernel(x_ref, s9_ref, s25_ref, recip_ref,
                    w0, s0, h0,
                    w10, s10, h10, w11, s11, h11,
                    w20, s20, h20, w21, s21, h21, w22, s22, h22,
                    w30, s30, h30,
                    o0_ref, o1_ref, o2_ref, o3_ref):
    xb = x_ref[...].astype(jnp.bfloat16)
    # branch0: 1x1 -> 96
    o0_ref[...] = _bc1x1(xb, w0, s0, h0)
    # branch1: 1x1 -> 48, 5x5 pad2 -> 64
    t = _bc1x1(xb, w10, s10, h10)
    o1_ref[...] = _bconv(t, s25_ref, w11, s11, h11)
    # branch2: 1x1 -> 64, 3x3 pad1 -> 96, 3x3 pad1 -> 96
    t = _bc1x1(xb, w20, s20, h20)
    t = _bconv(t, s9_ref, w21, s21, h21)
    o2_ref[...] = _bconv(t, s9_ref, w22, s22, h22)
    # branch3: avg pool 3x3 s1 p1 (count_include_pad=False) then 1x1 -> 64
    pacc = None
    for k in range(9):
        p = jnp.dot(s9_ref[k], xb, preferred_element_type=jnp.float32)
        pacc = p if pacc is None else pacc + p
    pooled = (pacc * recip_ref[...]).astype(jnp.bfloat16)
    o3_ref[...] = _bc1x1(pooled, w30, s30, h30)


def _mixed6a_kernel(x_ref, s9p_ref, s9v_ref,
                    w0, s0, h0,
                    w10, s10, h10, w11, s11, h11, w12, s12, h12,
                    o0_ref, o1_ref, o2_ref):
    xb = x_ref[...].astype(jnp.bfloat16)
    # branch0: 3x3 stride2 (valid) -> 384
    o0_ref[...] = _bconv(xb, s9v_ref, w0, s0, h0)
    # branch1: 1x1 -> 256, 3x3 pad1 -> 256, 3x3 stride2 -> 384
    t = _bc1x1(xb, w10, s10, h10)
    t = _bconv(t, s9p_ref, w11, s11, h11)
    o1_ref[...] = _bconv(t, s9v_ref, w12, s12, h12)
    # branch2: max pool 3x3 stride2 (valid)
    o2_ref[...] = _tap_maxpool(xb, s9v_ref).astype(o2_ref.dtype)


def _mixed7a_kernel(x_ref, s9p_ref, s9v_ref,
                    w00, s00, h00, w01, s01, h01,
                    w10, s10, h10, w11, s11, h11,
                    w20, s20, h20, w21, s21, h21, w22, s22, h22,
                    o0_ref, o1_ref, o2_ref, o3_ref):
    xb = x_ref[...].astype(jnp.bfloat16)
    t = _bc1x1(xb, w00, s00, h00)
    o0_ref[...] = _bconv(t, s9v_ref, w01, s01, h01)           # 1x1 -> 3x3 s2 -> 384
    t = _bc1x1(xb, w10, s10, h10)
    o1_ref[...] = _bconv(t, s9v_ref, w11, s11, h11)           # 1x1 -> 3x3 s2 -> 288
    t = _bc1x1(xb, w20, s20, h20)
    t = _bconv(t, s9p_ref, w21, s21, h21)                     # 1x1 -> 3x3 p1
    o2_ref[...] = _bconv(t, s9v_ref, w22, s22, h22)           # -> 3x3 s2 -> 320
    o3_ref[...] = _tap_maxpool(xb, s9v_ref).astype(o3_ref.dtype)   # max pool 3x3 s2


def _head_kernel(x_ref, w1, b1, w2, b2, w3, b3, o_ref):
    """Classifier head: Linear(1536,256)+ReLU, Linear(256,128)+ReLU, Linear(128,C)."""
    h = x_ref[...].astype(jnp.bfloat16)
    h = jnp.maximum(jnp.dot(h, w1[...], preferred_element_type=jnp.float32) + b1[...], 0.0)
    h = jnp.maximum(jnp.dot(h.astype(jnp.bfloat16), w2[...],
                            preferred_element_type=jnp.float32) + b2[...], 0.0)
    o_ref[...] = (jnp.dot(h.astype(jnp.bfloat16), w3[...],
                          preferred_element_type=jnp.float32) + b3[...]).astype(o_ref.dtype)


# ----------------------------------------------------------------------------
# Pallas-backed ops (thin JAX wrappers)
# ----------------------------------------------------------------------------

def _pick_tn(N):
    # tn always divides N exactly (or equals N) so the lane dim is never masked.
    if N % 256 == 0:
        return 256
    if N % 128 == 0:
        return 128
    return N


@functools.partial(jax.jit, static_argnames=("relu", "out_dtype"))
def fused_matmul(x, w, scale, shift, *, relu=False, out_dtype=jnp.bfloat16):
    """y = act((x @ w) * scale + shift); x:(M,K), w:(K,N); full-K blocks, N-outer/M-inner grid."""
    M, K = x.shape
    N = w.shape[-1]
    x = x.astype(jnp.bfloat16)
    w = w.reshape(K, N).astype(jnp.bfloat16)
    s = scale.astype(jnp.float32).reshape(1, N)
    b = shift.astype(jnp.float32).reshape(1, N)

    tm = 256 if M >= 256 else _round_up(M, 16)     # 16-row multiple (bf16 sublane packing)
    tn = _pick_tn(N)
    grid = (pl.cdiv(N, tn), pl.cdiv(M, tm))        # N outer: weight tile stays resident over M

    return pl.pallas_call(
        functools.partial(_mm_bn_act_kernel, relu=relu),
        out_shape=jax.ShapeDtypeStruct((M, N), out_dtype),
        grid=grid,
        in_specs=[
            pl.BlockSpec((tm, K), lambda j, i: (i, 0)),
            pl.BlockSpec((K, tn), lambda j, i: (0, j)),
            pl.BlockSpec((1, tn), lambda j, i: (0, j)),
            pl.BlockSpec((1, tn), lambda j, i: (0, j)),
        ],
        out_specs=pl.BlockSpec((tm, tn), lambda j, i: (i, j)),
        compiler_params=_cparams(dimension_semantics=("parallel", "parallel")),
    )(x, w, s, b)


@functools.partial(jax.jit, static_argnames=("stride", "padding", "relu"))
def conv2d(x, w, scale, shift, *, stride=(1, 1), padding=(0, 0), relu=True):
    """Stem conv: fast 1x1 path, otherwise bf16 im2col + fused Pallas matmul (NHWC)."""
    B, H, W, Ci = x.shape
    KH, KW, _, Co = w.shape
    sh, sw = stride
    ph, pw = padding
    if KH == 1 and KW == 1 and stride == (1, 1) and padding == (0, 0):
        y = fused_matmul(x.reshape(B * H * W, Ci), w.reshape(Ci, Co), scale, shift, relu=relu)
        return y.reshape(B, H, W, Co)
    xp = jnp.pad(x, ((0, 0), (ph, ph), (pw, pw), (0, 0)))
    Ho = (H + 2 * ph - KH) // sh + 1
    Wo = (W + 2 * pw - KW) // sw + 1
    cols = [xp[:, kh:kh + (Ho - 1) * sh + 1:sh, kw:kw + (Wo - 1) * sw + 1:sw, :]
            for kh in range(KH) for kw in range(KW)]
    patches = jnp.concatenate(cols, axis=-1).reshape(B * Ho * Wo, KH * KW * Ci)
    y = fused_matmul(patches, w.reshape(KH * KW * Ci, Co), scale, shift, relu=relu)
    return y.reshape(B, Ho, Wo, Co)


@functools.partial(jax.jit, static_argnames=("k", "stride"))
def max_pool2d(x, *, k=3, stride=2):
    B, H, W, C = x.shape
    Ho = (H - k) // stride + 1
    Wo = (W - k) // stride + 1
    slices = [x[:, kh:kh + (Ho - 1) * stride + 1:stride,
                kw:kw + (Wo - 1) * stride + 1:stride, :]
              for kh in range(k) for kw in range(k)]
    stack = jnp.stack(slices, 0).reshape(k * k, B * Ho * Wo, C)
    out = pl.pallas_call(
        _max_window_kernel,
        out_shape=jax.ShapeDtypeStruct((B * Ho * Wo, C), x.dtype),
        compiler_params=_cparams(),
    )(stack)
    return out.reshape(B, Ho, Wo, C)


# --- tap-selection matrices (one-hot row gathers used by the fused trunk kernels) ------------

@functools.lru_cache(maxsize=None)
def _tap_mats(B, H, W, KH, KW, sh, sw, ph, pw):
    Ho = (H + 2 * ph - KH) // sh + 1
    Wo = (W + 2 * pw - KW) // sw + 1
    Min, Mout = B * H * W, B * Ho * Wo
    S = np.zeros((KH * KW, Mout, Min), np.float32)
    for kh in range(KH):
        for kw in range(KW):
            t = kh * KW + kw
            for b in range(B):
                for ho in range(Ho):
                    hi = ho * sh - ph + kh
                    if not (0 <= hi < H):
                        continue
                    for wo in range(Wo):
                        wi = wo * sw - pw + kw
                        if 0 <= wi < W:
                            S[t, (b * Ho + ho) * Wo + wo, (b * H + hi) * W + wi] = 1.0
    return jnp.asarray(S, jnp.bfloat16)


@functools.lru_cache(maxsize=None)
def _avgpool_recip(B, H, W):
    """1/count for 3x3 stride-1 pad-1 avg pool with count_include_pad=False."""
    cnt = np.zeros((H, W), np.float32)
    for kh in range(3):
        for kw in range(3):
            for h in range(H):
                for w in range(W):
                    if 0 <= h - 1 + kh < H and 0 <= w - 1 + kw < W:
                        cnt[h, w] += 1.0
    r = np.tile((1.0 / cnt).reshape(1, H * W), (B, 1)).reshape(B * H * W, 1)
    return jnp.asarray(r, jnp.float32)


# --- fused trunk / head pallas_call wrappers (jitted, whole-array VMEM blocks) ----------------

@jax.jit
def _mixed5b_call(x2d, s9, s25, recip, ws):
    M = x2d.shape[0]
    chans = (ws[2].shape[1], ws[8].shape[1], ws[17].shape[1], ws[20].shape[1])
    outs = tuple(jax.ShapeDtypeStruct((M, c), jnp.bfloat16) for c in chans)
    o = pl.pallas_call(_mixed5b_kernel, out_shape=outs, compiler_params=_cparams())(
        x2d, s9, s25, recip, *ws)
    return jnp.concatenate(o, axis=-1).astype(jnp.float32)


@jax.jit
def _mixed6a_call(x2d, s9p, s9v, ws):
    mout = s9v.shape[1]
    chans = (ws[2].shape[1], ws[11].shape[1], x2d.shape[1])
    outs = tuple(jax.ShapeDtypeStruct((mout, c), jnp.bfloat16) for c in chans)
    o = pl.pallas_call(_mixed6a_kernel, out_shape=outs, compiler_params=_cparams())(
        x2d, s9p, s9v, *ws)
    return jnp.concatenate(o, axis=-1).astype(jnp.float32)


@jax.jit
def _mixed7a_call(x2d, s9p, s9v, ws):
    mout = s9v.shape[1]
    chans = (ws[5].shape[1], ws[11].shape[1], ws[20].shape[1], x2d.shape[1])
    outs = tuple(jax.ShapeDtypeStruct((mout, c), jnp.bfloat16) for c in chans)
    o = pl.pallas_call(_mixed7a_kernel, out_shape=outs, compiler_params=_cparams())(
        x2d, s9p, s9v, *ws)
    return jnp.concatenate(o, axis=-1).astype(jnp.float32)


@functools.partial(jax.jit, static_argnames=("scale", "relu"))
def _block35_call(x2d, s9, ws, *, scale, relu):
    kern = functools.partial(_block35_kernel, scale=scale, relu=relu)
    return pl.pallas_call(kern, out_shape=jax.ShapeDtypeStruct(x2d.shape, jnp.float32),
                          compiler_params=_cparams())(x2d, s9, *ws)


@functools.partial(jax.jit, static_argnames=("scale", "relu"))
def _block2_call(x2d, sa, sb, ws, *, scale, relu):
    kern = functools.partial(_block2_kernel, scale=scale, relu=relu)
    return pl.pallas_call(kern, out_shape=jax.ShapeDtypeStruct(x2d.shape, jnp.float32),
                          compiler_params=_cparams())(x2d, sa, sb, *ws)


@jax.jit
def _head_call(feat, w1, b1, w2, b2, w3, b3):
    B = feat.shape[0]
    n = w3.shape[1]
    return pl.pallas_call(_head_kernel, out_shape=jax.ShapeDtypeStruct((B, n), jnp.float32),
                          compiler_params=_cparams())(
        feat.astype(jnp.bfloat16), w1, b1, w2, b2, w3, b3)


# ----------------------------------------------------------------------------
# Parameter initialization (deterministic, synthetic; weights bf16, BN folded in f32)
# ----------------------------------------------------------------------------

class KeyGen:
    def __init__(self, key):
        self.key = key

    def __call__(self):
        self.key, k = jax.random.split(self.key)
        return k


def _fold_bn(gamma, beta, mean, var, eps=1e-3):
    scale = gamma * jax.lax.rsqrt(var + eps)
    shift = beta - mean * scale
    return scale, shift


def init_bc(kg, cin, cout, k, *, flat=False):
    """BasicConv2d = Conv2d(bias=False) + BatchNorm2d(eps=1e-3) + ReLU (BN folded).
    flat=True stores the kernel-ready layout for the fused trunk kernels."""
    if isinstance(k, int):
        k = (k, k)
    kh, kw = k
    fan_in = kh * kw * cin
    w = (jax.random.normal(kg(), (kh, kw, cin, cout), jnp.float32)
         / np.sqrt(fan_in)).astype(jnp.bfloat16)
    gamma = 0.5 + 0.5 * jax.random.uniform(kg(), (cout,), jnp.float32)
    beta = 0.1 * jax.random.normal(kg(), (cout,), jnp.float32)
    mean = 0.1 * jax.random.normal(kg(), (cout,), jnp.float32)
    var = 0.5 + jax.random.uniform(kg(), (cout,), jnp.float32)
    scale, shift = _fold_bn(gamma, beta, mean, var)
    if flat:
        wflat = w.reshape(cin, cout) if (kh == 1 and kw == 1) else w.reshape(kh * kw, cin, cout)
        return {'w': wflat, 'scale': scale.reshape(1, cout), 'shift': shift.reshape(1, cout)}
    return {'w': w, 'scale': scale, 'shift': shift}


def init_proj(kg, cins, cout):
    """Residual-block 1x1 projection Conv2d(sum(cins), cout, bias=True), pre-split per branch."""
    fan_in = sum(cins)
    ws = tuple((jax.random.normal(kg(), (ci, cout), jnp.float32)
                / np.sqrt(fan_in)).astype(jnp.bfloat16) for ci in cins)
    b = 0.05 * jax.random.normal(kg(), (1, cout), jnp.float32)
    return {'ws': ws, 'b': b}


def init_linear(kg, cin, cout):
    w = (jax.random.normal(kg(), (cin, cout), jnp.float32) / np.sqrt(cin)).astype(jnp.bfloat16)
    b = 0.05 * jax.random.normal(kg(), (1, cout), jnp.float32)
    return {'w': w, 'b': b}


def init_params(key, num_classes=7):
    kg = KeyGen(key)
    P = {}
    # stem (used via conv2d / fused_matmul)
    P['conv2d_1a'] = init_bc(kg, 3, 32, 3)
    P['conv2d_2a'] = init_bc(kg, 32, 32, 3)
    P['conv2d_2b'] = init_bc(kg, 32, 64, 3)
    P['conv2d_3b'] = init_bc(kg, 64, 80, 1)
    P['conv2d_4a'] = init_bc(kg, 80, 192, 3)
    # mixed_5b (fused kernel)
    P['mixed_5b'] = dict(
        b0=init_bc(kg, 192, 96, 1, flat=True),
        b1_0=init_bc(kg, 192, 48, 1, flat=True),
        b1_1=init_bc(kg, 48, 64, 5, flat=True),
        b2_0=init_bc(kg, 192, 64, 1, flat=True),
        b2_1=init_bc(kg, 64, 96, 3, flat=True),
        b2_2=init_bc(kg, 96, 96, 3, flat=True),
        b3=init_bc(kg, 192, 64, 1, flat=True))
    P['block35'] = [dict(
        b0=init_bc(kg, 320, 32, 1, flat=True),
        b1_0=init_bc(kg, 320, 32, 1, flat=True),
        b1_1=init_bc(kg, 32, 32, 3, flat=True),
        b2_0=init_bc(kg, 320, 32, 1, flat=True),
        b2_1=init_bc(kg, 32, 48, 3, flat=True),
        b2_2=init_bc(kg, 48, 64, 3, flat=True),
        proj=init_proj(kg, (32, 32, 64), 320)) for _ in range(10)]
    P['mixed_6a'] = dict(
        b0=init_bc(kg, 320, 384, 3, flat=True),
        b1_0=init_bc(kg, 320, 256, 1, flat=True),
        b1_1=init_bc(kg, 256, 256, 3, flat=True),
        b1_2=init_bc(kg, 256, 384, 3, flat=True))
    P['block17'] = [dict(
        b0=init_bc(kg, 1088, 192, 1, flat=True),
        b1_0=init_bc(kg, 1088, 128, 1, flat=True),
        b1_1=init_bc(kg, 128, 160, (1, 7), flat=True),
        b1_2=init_bc(kg, 160, 192, (7, 1), flat=True),
        proj=init_proj(kg, (192, 192), 1088)) for _ in range(20)]
    P['mixed_7a'] = dict(
        b0_0=init_bc(kg, 1088, 256, 1, flat=True),
        b0_1=init_bc(kg, 256, 384, 3, flat=True),
        b1_0=init_bc(kg, 1088, 256, 1, flat=True),
        b1_1=init_bc(kg, 256, 288, 3, flat=True),
        b2_0=init_bc(kg, 1088, 256, 1, flat=True),
        b2_1=init_bc(kg, 256, 288, 3, flat=True),
        b2_2=init_bc(kg, 288, 320, 3, flat=True))
    P['block8'] = [dict(
        b0=init_bc(kg, 2080, 192, 1, flat=True),
        b1_0=init_bc(kg, 2080, 192, 1, flat=True),
        b1_1=init_bc(kg, 192, 224, (1, 3), flat=True),
        b1_2=init_bc(kg, 224, 256, (3, 1), flat=True),
        proj=init_proj(kg, (192, 256), 2080)) for _ in range(10)]   # last = no-ReLU block8
    P['conv2d_7b'] = init_bc(kg, 2080, 1536, 1, flat=True)
    # custom classifier head
    P['fc1'] = init_linear(kg, 1536, 256)
    P['fc2'] = init_linear(kg, 256, 128)
    P['fc3'] = init_linear(kg, 128, num_classes)
    return P


# ----------------------------------------------------------------------------
# Model forward (orchestration; all hot-path math runs inside the Pallas kernels)
# ----------------------------------------------------------------------------

def _args(p):
    return (p['w'], p['scale'], p['shift'])


def basic_conv(x, p, stride=(1, 1), padding=(0, 0)):
    return conv2d(x, p['w'], p['scale'], p['shift'], stride=stride, padding=padding, relu=True)


def mixed_5b_fwd(x2d, p, B, H, W):
    s9 = _tap_mats(B, H, W, 3, 3, 1, 1, 1, 1)
    s25 = _tap_mats(B, H, W, 5, 5, 1, 1, 2, 2)
    recip = _avgpool_recip(B, H, W)
    ws = (_args(p['b0']) + _args(p['b1_0']) + _args(p['b1_1'])
          + _args(p['b2_0']) + _args(p['b2_1']) + _args(p['b2_2']) + _args(p['b3']))
    return _mixed5b_call(x2d, s9, s25, recip, ws)


def mixed_6a_fwd(x2d, p, B, H, W):
    s9p = _tap_mats(B, H, W, 3, 3, 1, 1, 1, 1)
    s9v = _tap_mats(B, H, W, 3, 3, 2, 2, 0, 0)
    ws = _args(p['b0']) + _args(p['b1_0']) + _args(p['b1_1']) + _args(p['b1_2'])
    Ho = (H - 3) // 2 + 1
    Wo = (W - 3) // 2 + 1
    return _mixed6a_call(x2d, s9p, s9v, ws), Ho, Wo


def mixed_7a_fwd(x2d, p, B, H, W):
    s9p = _tap_mats(B, H, W, 3, 3, 1, 1, 1, 1)
    s9v = _tap_mats(B, H, W, 3, 3, 2, 2, 0, 0)
    ws = (_args(p['b0_0']) + _args(p['b0_1']) + _args(p['b1_0']) + _args(p['b1_1'])
          + _args(p['b2_0']) + _args(p['b2_1']) + _args(p['b2_2']))
    Ho = (H - 3) // 2 + 1
    Wo = (W - 3) // 2 + 1
    return _mixed7a_call(x2d, s9p, s9v, ws), Ho, Wo


def block35_fwd(x2d, p, B, H, W, *, scale, relu):
    s9 = _tap_mats(B, H, W, 3, 3, 1, 1, 1, 1)
    ws = (_args(p['b0']) + _args(p['b1_0']) + _args(p['b1_1'])
          + _args(p['b2_0']) + _args(p['b2_1']) + _args(p['b2_2'])
          + p['proj']['ws'] + (p['proj']['b'],))
    return _block35_call(x2d, s9, ws, scale=scale, relu=relu)


def block17_fwd(x2d, p, B, H, W, *, scale, relu):
    sa = _tap_mats(B, H, W, 1, 7, 1, 1, 0, 3)
    sb = _tap_mats(B, H, W, 7, 1, 1, 1, 3, 0)
    ws = (_args(p['b0']) + _args(p['b1_0']) + _args(p['b1_1']) + _args(p['b1_2'])
          + p['proj']['ws'] + (p['proj']['b'],))
    return _block2_call(x2d, sa, sb, ws, scale=scale, relu=relu)


def block8_fwd(x2d, p, B, H, W, *, scale, relu):
    sa = _tap_mats(B, H, W, 1, 3, 1, 1, 0, 1)
    sb = _tap_mats(B, H, W, 3, 1, 1, 1, 1, 0)
    ws = (_args(p['b0']) + _args(p['b1_0']) + _args(p['b1_1']) + _args(p['b1_2'])
          + p['proj']['ws'] + (p['proj']['b'],))
    return _block2_call(x2d, sa, sb, ws, scale=scale, relu=relu)


def head_fwd(feat, P):
    return _head_call(feat, P['fc1']['w'], P['fc1']['b'],
                      P['fc2']['w'], P['fc2']['b'], P['fc3']['w'], P['fc3']['b'])


def inception_resnet_v2_forward(x_nchw, P):
    # NCHW (PyTorch) -> NHWC (kernel); stem activations carried in bf16.
    x = jnp.transpose(x_nchw, (0, 2, 3, 1)).astype(jnp.bfloat16)

    # stem
    x = basic_conv(x, P['conv2d_1a'], stride=(2, 2))
    x = basic_conv(x, P['conv2d_2a'])
    x = basic_conv(x, P['conv2d_2b'], padding=(1, 1))
    x = max_pool2d(x, k=3, stride=2)
    x = basic_conv(x, P['conv2d_3b'])
    x = basic_conv(x, P['conv2d_4a'])
    x = max_pool2d(x, k=3, stride=2)

    # inception-resnet trunk; flattened (M = B*H*W, C) layout, residual path carried in f32
    B, H, W, C = x.shape
    t = mixed_5b_fwd(x.reshape(B * H * W, C), P['mixed_5b'], B, H, W)       # (M, 320)
    for bp in P['block35']:
        t = block35_fwd(t, bp, B, H, W, scale=0.17, relu=True)
    t, H, W = mixed_6a_fwd(t, P['mixed_6a'], B, H, W)                       # (M', 1088)
    for bp in P['block17']:
        t = block17_fwd(t, bp, B, H, W, scale=0.10, relu=True)
    t, H, W = mixed_7a_fwd(t, P['mixed_7a'], B, H, W)                       # (M'', 2080)
    for bp in P['block8'][:-1]:
        t = block8_fwd(t, bp, B, H, W, scale=0.20, relu=True)
    t = block8_fwd(t, P['block8'][-1], B, H, W, scale=1.0, relu=False)

    # conv2d_7b (1x1 BasicConv2d) -> (M'', 1536)
    p7 = P['conv2d_7b']
    t = fused_matmul(t, p7['w'], p7['scale'], p7['shift'], relu=True)

    # timm global average pool + flatten -> (B, 1536); at 75x75 input the map is already 1x1.
    if H * W == 1:
        feat = t
    else:
        feat = jnp.mean(t.reshape(B, H * W, -1).astype(jnp.float32),
                        axis=1).astype(jnp.bfloat16)   # TODO(synk): in-kernel pool for H*W > 1

    # custom classifier head (AdaptiveAvgPool2d((5,5)) / Flatten are identity on (B,1536),
    # Dropout(0.3) is identity at inference)
    return head_fwd(feat, P)


# ----------------------------------------------------------------------------
# main
# ----------------------------------------------------------------------------

if __name__ == "__main__":
    key = jax.random.PRNGKey(0)
    pkey, xkey = jax.random.split(key)

    params = init_params(pkey, num_classes=7)

    # 75x75 is the smallest spatial size that survives the stem's valid convs / stride-2 stages.
    x = jax.random.normal(xkey, (2, 3, 75, 75), jnp.float32)

    logits = inception_resnet_v2_forward(x, params)
    logits = jax.block_until_ready(logits)

    assert logits.shape == (2, 7), logits.shape
    assert bool(jnp.all(jnp.isfinite(logits)))
    print("KERNEL_OK")
</pallas_src>

<mosaic_0001>
module attributes {stable_mosaic.version = 11 : i64} {
  func.func @_mm_bn_act_kernel(%arg0: i32, %arg1: i32, %arg2: memref<256x27xbf16, #tpu.memory_space<vmem>>, %arg3: memref<27x32xbf16, #tpu.memory_space<vmem>>, %arg4: memref<1x32xf32, #tpu.memory_space<vmem>>, %arg5: memref<1x32xf32, #tpu.memory_space<vmem>>, %arg6: memref<256x32xbf16, #tpu.memory_space<vmem>>) attributes {dimension_semantics = [#tpu.dimension_semantics<parallel>, #tpu.dimension_semantics<parallel>], iteration_bounds = array<i64: 1, 11>, scalar_prefetch = 0 : i64, scratch_operands = 0 : i64, tpu.core_type = #tpu.core_type<tc>, window_params = [{transform_indices = @transform_0, window_bounds = array<i64: 256, 27>}, {transform_indices = @transform_1, window_bounds = array<i64: 27, 32>}, {transform_indices = @transform_2, window_bounds = array<i64: 1, 32>}, {transform_indices = @transform_3, window_bounds = array<i64: 1, 32>}, {transform_indices = @transform_4, window_bounds = array<i64: 256, 32>}]} {
    %c0 = arith.constant 0 : index
    %c0_0 = arith.constant 0 : index
    %0 = vector.load %arg2[%c0, %c0_0] : memref<256x27xbf16, #tpu.memory_space<vmem>>, vector<256x27xbf16>
    %c0_1 = arith.constant 0 : index
    %c0_2 = arith.constant 0 : index
    %1 = vector.load %arg3[%c0_1, %c0_2] : memref<27x32xbf16, #tpu.memory_space<vmem>>, vector<27x32xbf16>
    %cst = arith.constant dense<0.000000e+00> : vector<256x32xf32>
    %2 = tpu.matmul %0, %1, %cst {dimension_numbers = #tpu.dot_dimension_numbers<[1], [0], [0], [1], [0, 0, 1, 1], [], []>} : vector<256x27xbf16>, vector<27x32xbf16>, vector<256x32xf32> -> vector<256x32xf32>
    %c0_3 = arith.constant 0 : index
    %c0_4 = arith.constant 0 : index
    %3 = vector.load %arg4[%c0_3, %c0_4] : memref<1x32xf32, #tpu.memory_space<vmem>>, vector<1x32xf32>
    %4 = vector.broadcast %3 : vector<1x32xf32> to vector<256x32xf32>
    %5 = arith.mulf %2, %4 : vector<256x32xf32>
    %c0_5 = arith.constant 0 : index
    %c0_6 = arith.constant 0 : index
    %6 = vector.load %arg5[%c0_5, %c0_6] : memref<1x32xf32, #tpu.memory_space<vmem>>, vector<1x32xf32>
    %7 = vector.broadcast %6 : vector<1x32xf32> to vector<256x32xf32>
    %8 = arith.addf %5, %7 : vector<256x32xf32>
    %cst_7 = arith.constant 0.000000e+00 : f32
    %9 = vector.broadcast %cst_7 : f32 to vector<256x32xf32>
    %10 = arith.maximumf %8, %9 : vector<256x32xf32>
    %11 = arith.truncf %10 : vector<256x32xf32> to vector<256x32xbf16>
    %c0_8 = arith.constant 0 : index
    %c0_9 = arith.constant 0 : index
    %12 = vector.load %arg6[%c0_8, %c0_9] : memref<256x32xbf16, #tpu.memory_space<vmem>>, vector<256x32xbf16>
    tpu.vector_store %arg6[%c0_8, %c0_9], %11 {strides = array<i32>} : memref<256x32xbf16, #tpu.memory_space<vmem>>, vector<256x32xbf16>,
    return
  }
  func.func @transform_0(%arg0: i32, %arg1: i32) -> (i32, i32) {
    %c0_i32 = arith.constant 0 : i32
    %c0_i32_0 = arith.constant 0 : i32
    return %arg1, %c0_i32 : i32, i32
  }
  func.func @transform_1(%arg0: i32, %arg1: i32) -> (i32, i32) {
    %c0_i32 = arith.constant 0 : i32
    %c0_i32_0 = arith.constant 0 : i32
    return %c0_i32, %arg0 : i32, i32
  }
  func.func @transform_2(%arg0: i32, %arg1: i32) -> (i32, i32) {
    %c0_i32 = arith.constant 0 : i32
    %c0_i32_0 = arith.constant 0 : i32
    return %c0_i32, %arg0 : i32, i32
  }
  func.func @transform_3(%arg0: i32, %arg1: i32) -> (i32, i32) {
    %c0_i32 = arith.constant 0 : i32
    %c0_i32_0 = arith.constant 0 : i32
    return %c0_i32, %arg0 : i32, i32
  }
  func.func @transform_4(%arg0: i32, %arg1: i32) -> (i32, i32) {
    %c0_i32 = arith.constant 0 : i32
    return %arg1, %arg0 : i32, i32
  }
}

</mosaic_0001>

<bundles_post_ra>
// kernel: fused_matmul.1
= control target key start
LH: loop header
LB: loop body
LE: loop exit
PB: predicated region body
PF: predicated region fallthrough
CT: control target
= control target key end

     0   :  { %s1726_s15 = smov 0   ;;  %s1728_s16 = smov 0   ;;  %s2098_s0 = inlined_call_operand.vmem [shape: bf16[2738,27], index: 0, kind: input, shape index: {}]   ;;  %s2099_s1 = inlined_call_operand.vmem [shape: bf16[27,32], index: 1, kind: input, shape index: {}]   ;;  %s2100_s2 = inlined_call_operand.vmem [shape: f32[1,32], index: 2, kind: input, shape index: {}]   ;;  %s2101_s3 = inlined_call_operand.vmem [shape: f32[1,32], index: 3, kind: input, shape index: {}]   ;;  %s2102_s4 = inlined_call_operand.vmem [shape: bf16[2738,32], index: 4, kind: output, shape index: {}]  }
   0x1   :  { %s1730_s17 = smov 0   ;;  %s1732_s18 = smov 0  }
   0x2   :  { %s1734_s19 = smov 0  }
   0x3 LB: > { %s1284_s20 = sadd.s32 4294967295, %s1666_s19   ;;  %s23_s21 = sadd.s32 1, %s1662_s18  ;;  %s1666_s19 = sphi %s1734_s19, %s14_s19   ;;  %s1662_s18 = sphi %s1732_s18, %s2110_s18   ;;  %s1658_s17 = sphi %s1730_s17, %s2109_s17   ;;  %s1654_s16 = sphi %s1728_s16, %s2108_s16   ;;  %s1650_s15 = sphi %s1726_s15, %s2107_s15  }
   0x4   : > { %p24_p0 = scmp.ge.s32.totalorder %s23_s21, 11  ;;  %s139_s22 = sadd.s32 1, %s1654_s16 }
   0x5   : > { %p149_p1 = scmp.ne.s32.totalorder %s1654_s16, %s1650_s15  ;;  %p150_p2 = scmp.eq.s32.totalorder %s1284_s20, 10 }
   0x6   : > { %s2112_s21 = smov (%p24_p0, %s23_s21), 0  ;;  %p1291_p4 = scmp.ge.s32.totalorder %s1666_s19, 1 }
   0x7   : > { %p1758_p3 = por %p150_p2, %p149_p1  ;;  %s134_s24 = ssub.s32 %s1662_s18, %s2112_s21 }
   0x8   : > { %p210_p5 = scmp.lt.s32.totalorder %s1666_s19, 12  ;;  %p137_p6 = scmp.eq.s32.totalorder %s134_s24, 0 }
   0xa   : > { %p211_p7 = pnand %p1291_p4, %p210_p5 }
   0xb   : > { %s1767_s25 = scalar_select %p137_p6, %s1654_s16, %s139_s22  }
   0xc   : > { %214 = sbr.rel (%p211_p7) target bundleno = 325 (0x145), region = 36  ;;  %s1773_s28 = sshll.u32 (!%p211_p7), %s1658_s17, 5 }
   0xd   : > { %p254_p8 = scmp.lt.s32.totalorder (!%p211_p7), %s1773_s28, 342  ;;  %s246_s12 = sand.u32 (!%p211_p7), 1, %s1650_s15  }
   0xe   : > { %s1292_s20 = sshll.u32 (!%p211_p7), %s246_s12, 7 }
   0xf   : > { %s1842_s15 = scalar_lea.vmem (!%p211_p7), [#allocation2], %s1292_s20  }
  0x11   : > { %v1578_v0 = vld [vmem:[%s2099_s1 + $0x8] sm:$0x3f]   ;;  %vm455_vm0 = vcmask 1044480   ;;  %vm456_vm1 = vcmask 1045504   ;;  %v1700_v1 = vmov 65535   ;;  %v1579_v5 = vld [vmem:[%s2099_s1] sm:$0xff]  }
  0x12   : > { %v457_v2 = vsel %vm455_vm0, 4294967295, %v1700_v1  ;;  %s255_s5 = scalar_select %p254_p8, %s1773_s28, 342  ;;  %vm406_vm2 = vcmask 220160   ;;  %v1820_v22 = vld [vmem:[%s2100_s2] ss:$0 sm:$0xff]  ;;  %vm861_vm3 = vcmask 257024  }
  0x13   : > { %v458_v3 = vsel %vm456_vm1, %v457_v2, 0  ;;  %v1826_v24 = vld [vmem:[%s2101_s3] ss:$0 sm:$0xff]  ;;  %s902_s22 = ssub.s32 (%p1758_p3), 343, %s1773_s28  ;;  %s1412_s24 = sshll.u32 (%p1758_p3), %s1658_s17, 7 }
  0x14   : > { %v460_v4 = vand.u32 %v1578_v0, %v458_v3  ;;  %s1294_s6 = sshll.u32 %s255_s5, 2  ;;  %p903_p9 = scmp.lt.s32.totalorder (%p1758_p3), %s902_s22, 32 }
  0x15   : > { %s1783_s9 = scalar_lea.vmem %s2098_s0, %s1294_s6  ;;  %s1965_s29 = scalar_lea.vmem (%p1758_p3), %s2102_s4, %s1412_s24  }
  0x16   : > { %1433 = vmatprep.subr.bf16.mxu0 %v460_v4  ;;  %1469 = vmatprep.subr.bf16.mxu1 %v460_v4  ;;  %v1580_v6 = vld [vmem:[%s1783_s9] sm:$0xff]   ;;  %v1582_v8 = vld [vmem:[%s1783_s9 + $0x8] sm:$0xff]   ;;  %v1584_v10 = vld [vmem:[%s1783_s9 + $0x10] sm:$0xff]  }
  0x17   : > { %1434 = vmatpush3.bf16.msra.mxu0 %v460_v4  ;;  %1471 = vmatpush3.bf16.msra.mxu1 %v460_v4  ;;  %v1581_v7 = vld [vmem:[%s1783_s9 + $0x40] sm:$0xff]   ;;  %v1583_v9 = vld [vmem:[%s1783_s9 + $0x48] sm:$0xff]   ;;  %v1585_v11 = vld [vmem:[%s1783_s9 + $0x50] sm:$0xff]  }
  0x18   : > { %1435 = vmatprep.subr.bf16.mxu0 %v1579_v5  ;;  %1470 = vmatprep.subr.bf16.mxu1 %v1579_v5  ;;  %v1586_v12 = vld [vmem:[%s1783_s9 + $0x18] sm:$0xff]   ;;  %v1588_v14 = vld [vmem:[%s1783_s9 + $0x20] sm:$0xff]   ;;  %v1590_v16 = vld [vmem:[%s1783_s9 + $0x28] sm:$0xff]  }
  0x19   : > { %1437 = vmatprep.mubr.msk.bf16.mxu0 %vm406_vm2, %v1580_v6  ;;  %1453 = vmatprep.mubr.msk.bf16.mxu1 %vm406_vm2, %v1581_v7  ;;  %v1587_v13 = vld [vmem:[%s1783_s9 + $0x58] sm:$0xff]   ;;  %v1589_v15 = vld [vmem:[%s1783_s9 + $0x60] sm:$0xff]   ;;  %v1591_v17 = vld [vmem:[%s1783_s9 + $0x68] sm:$0xff]  }
  0x1a   : > { %v1592_v18 = vld [vmem:[%s1783_s9 + $0x30] sm:$0xff]   ;;  %v1594_v20 = vld [vmem:[%s1783_s9 + $0x38] sm:$0xff]  }
  0x1b   : > { %1436 = vmatpush3.bf16.msra.mxu0 %v1579_v5  ;;  %1472 = vmatpush3.bf16.msra.mxu1 %v1579_v5  ;;  %v1593_v19 = vld [vmem:[%s1783_s9 + $0x70] sm:$0xff]   ;;  %v1595_v21 = vld [vmem:[%s1783_s9 + $0x78] sm:$0xff]  }
  0x1e   : > { %1438 = vmatmul.mubr.msk.bf16.vlgmr.msra.gmra.mxu0 %vm406_vm2, %v1582_v8  ;;  %1454 = vmatmul.mubr.msk.bf16.vlgmr.msra.gmra.mxu1 %vm406_vm2, %v1583_v9 }
  0x1f   : > { %1441 = vmatprep.mubr.msk.bf16.mxu0 %vm406_vm2, %v1584_v10  ;;  %1457 = vmatprep.mubr.msk.bf16.mxu1 %vm406_vm2, %v1585_v11 }
  0x26   : > { %1442 = vmatmul.mubr.msk.bf16.gmra.mxu0 %vm406_vm2, %v1586_v12  ;;  %1458 = vmatmul.mubr.msk.bf16.gmra.mxu1 %vm406_vm2, %v1587_v13 }
  0x27   : > { %1445 = vmatprep.mubr.msk.bf16.mxu0 %vm406_vm2, %v1588_v14  ;;  %1461 = vmatprep.mubr.msk.bf16.mxu1 %vm406_vm2, %v1589_v15 }
  0x2e   : > { %1446 = vmatmul.mubr.msk.bf16.gmra.mxu0 %vm406_vm2, %v1590_v16  ;;  %1462 = vmatmul.mubr.msk.bf16.gmra.mxu1 %vm406_vm2, %v1591_v17 }
  0x2f   : > { %1449 = vmatprep.mubr.msk.bf16.mxu0 %vm406_vm2, %v1592_v18  ;;  %1465 = vmatprep.mubr.msk.bf16.mxu1 %vm406_vm2, %v1593_v19 }
  0x36   : > { %1450 = vmatmul.mubr.msk.bf16.gmra.mxu0 %vm406_vm2, %v1594_v20  ;;  %1466 = vmatmul.mubr.msk.bf16.gmra.mxu1 %vm406_vm2, %v1595_v21 }
  0xde   : > { %v1439_v23 = vpop.f32.mrf.mxu0  ;;  %v1455_v25 = vpop.f32.mrf.mxu1 }
  0xdf   : > { %v632_v26 = vmul.f32 %v1439_v23, %v1820_v22  ;;  %v648_v27 = vmul.f32 %v1455_v25, %v1820_v22 }
  0xe0   : > { %v496_v28 = vpop.f32.mrf.mxu0  ;;  %v560_v29 = vpop.f32.mrf.mxu1 }
  0xe1   : > { %v671_v30 = vadd.f32 %v1826_v24, %v632_v26  ;;  %v687_v31 = vadd.f32 %v1826_v24, %v648_v27  ;;  %v630_v32 = vmul.f32 %v1820_v22, %v496_v28  ;;  %v646_v33 = vmul.f32 %v1820_v22, %v560_v29 }
  0xe2   : > { %v1440_v34 = vpop.f32.mrf.mxu0  ;;  %v1456_v35 = vpop.f32.mrf.mxu1 }
  0xe3   : > { %v703_v36 = vmax.f32 %v671_v30, 0.0  ;;  %v719_v37 = vmax.f32 %v687_v31, 0.0  ;;  %v669_v38 = vadd.f32 %v1826_v24, %v630_v32  ;;  %v685_v39 = vadd.f32 %v1826_v24, %v646_v33 }
  0xe4   : > { %v633_v40 = vmul.f32 %v1440_v34, %v1820_v22  ;;  %v649_v41 = vmul.f32 %v1456_v35, %v1820_v22  ;;  %v499_v42 = vpop.f32.mrf.mxu0  ;;  %v563_v43 = vpop.f32.mrf.mxu1 }
  0xe5   : > { %v1382_v44 = vpack.c.bf16 %v703_v36, %v703_v36  ;;  %v1398_v45 = vpack.c.bf16 %v719_v37, %v719_v37  ;;  %v701_v46 = vmax.f32 %v669_v38, 0.0  ;;  %v717_v47 = vmax.f32 %v685_v39, 0.0 }
  0xe6   : > { %v672_v48 = vadd.f32 %v1826_v24, %v633_v40  ;;  %v688_v49 = vadd.f32 %v1826_v24, %v649_v41  ;;  %v631_v50 = vmul.f32 %v1820_v22, %v499_v42  ;;  %v647_v51 = vmul.f32 %v1820_v22, %v563_v43  ;;  %v1443_v52 = vpop.f32.mrf.mxu0  ;;  %v1459_v53 = vpop.f32.mrf.mxu1 }
  0xe7   : > { %864 = vst.msk [vmem:[%s1842_s15 + $0x8] sm:$0xf] %vm861_vm3, %v1382_v44  ;;  %880 = vst.msk [vmem:[%s1842_s15 + $0x48] sm:$0xf] %vm861_vm3, %v1398_v45  ;;  %v1380_v54 = vpack.c.bf16 %v701_v46, %v701_v46  ;;  %v1396_v55 = vpack.c.bf16 %v717_v47, %v717_v47  ;;  %v636_v56 = vmul.f32 %v1443_v52, %v1820_v22 }
  0xe8   : > { %v652_v57 = vmul.f32 %v1459_v53, %v1820_v22  ;;  %v704_v58 = vmax.f32 %v672_v48, 0.0  ;;  %v720_v59 = vmax.f32 %v688_v49, 0.0  ;;  %v670_v60 = vadd.f32 %v1826_v24, %v631_v50  ;;  %v512_v62 = vpop.f32.mrf.mxu0  ;;  %v576_v63 = vpop.f32.mrf.mxu1 }
  0xe9   : > { %v686_v61 = vadd.f32 %v1826_v24, %v647_v51  ;;  %862 = vst.msk [vmem:[%s1842_s15] sm:$0xf] %vm861_vm3, %v1380_v54  ;;  %878 = vst.msk [vmem:[%s1842_s15 + $0x40] sm:$0xf] %vm861_vm3, %v1396_v55  ;;  %v675_v0 = vadd.f32 %v1826_v24, %v636_v56  ;;  %v634_v2 = vmul.f32 %v1820_v22, %v512_v62 }
  0xea   : > { %v691_v1 = vadd.f32 %v1826_v24, %v652_v57  ;;  %v650_v3 = vmul.f32 %v1820_v22, %v576_v63  ;;  %v1383_v4 = vpack.c.bf16 %v704_v58, %v704_v58  ;;  %v1399_v5 = vpack.c.bf16 %v720_v59, %v720_v59  ;;  %v1444_v8 = vpop.f32.mrf.mxu0  ;;  %v1460_v9 = vpop.f32.mrf.mxu1 }
  0xeb   : > { %v702_v6 = vmax.f32 %v670_v60, 0.0  ;;  %v718_v7 = vmax.f32 %v686_v61, 0.0  ;;  %v707_v10 = vmax.f32 %v675_v0, 0.0  ;;  %v673_v12 = vadd.f32 %v1826_v24, %v634_v2 }
  0xec   : > { %v723_v11 = vmax.f32 %v691_v1, 0.0  ;;  %v689_v13 = vadd.f32 %v1826_v24, %v650_v3  ;;  %865 = vst.msk [vmem:[%s1842_s15 + $0xc] sm:$0xf] %vm861_vm3, %v1383_v4  ;;  %881 = vst.msk [vmem:[%s1842_s15 + $0x4c] sm:$0xf] %vm861_vm3, %v1399_v5  ;;  %v637_v16 = vmul.f32 %v1444_v8, %v1820_v22  ;;  %v653_v17 = vmul.f32 %v1460_v9, %v1820_v22  ;;  %v515_v18 = vpop.f32.mrf.mxu0  ;;  %v579_v19 = vpop.f32.mrf.mxu1 }
  0xed   : > { %v1381_v14 = vpack.c.bf16 %v702_v6, %v702_v6  ;;  %v1397_v15 = vpack.c.bf16 %v718_v7, %v718_v7  ;;  %v1386_v20 = vpack.c.bf16 %v707_v10, %v707_v10  ;;  %v705_v23 = vmax.f32 %v673_v12, 0.0 }
  0xee   : > { %v1402_v21 = vpack.c.bf16 %v723_v11, %v723_v11  ;;  %v721_v25 = vmax.f32 %v689_v13, 0.0  ;;  %v676_v26 = vadd.f32 %v1826_v24, %v637_v16  ;;  %v692_v27 = vadd.f32 %v1826_v24, %v653_v17  ;;  %v1447_v30 = vpop.f32.mrf.mxu0  ;;  %v1463_v31 = vpop.f32.mrf.mxu1 }
  0xef   : > { %863 = vst.msk [vmem:[%s1842_s15 + $0x4] sm:$0xf] %vm861_vm3, %v1381_v14  ;;  %879 = vst.msk [vmem:[%s1842_s15 + $0x44] sm:$0xf] %vm861_vm3, %v1397_v15  ;;  %v635_v28 = vmul.f32 %v1820_v22, %v515_v18  ;;  %v651_v29 = vmul.f32 %v1820_v22, %v579_v19  ;;  %v1384_v32 = vpack.c.bf16 %v705_v23, %v705_v23 }
  0xf0   : > { %868 = vst.msk [vmem:[%s1842_s15 + $0x18] sm:$0xf] %vm861_vm3, %v1386_v20  ;;  %884 = vst.msk [vmem:[%s1842_s15 + $0x58] sm:$0xf] %vm861_vm3, %v1402_v21  ;;  %v1400_v33 = vpack.c.bf16 %v721_v25, %v721_v25  ;;  %v640_v34 = vmul.f32 %v1447_v30, %v1820_v22  ;;  %v656_v35 = vmul.f32 %v1463_v31, %v1820_v22  ;;  %v708_v36 = vmax.f32 %v676_v26, 0.0  ;;  %v528_v40 = vpop.f32.mrf.mxu0  ;;  %v592_v41 = vpop.f32.mrf.mxu1 }
  0xf1   : > { %v724_v37 = vmax.f32 %v692_v27, 0.0  ;;  %v674_v38 = vadd.f32 %v1826_v24, %v635_v28  ;;  %v690_v39 = vadd.f32 %v1826_v24, %v651_v29  ;;  %866 = vst.msk [vmem:[%s1842_s15 + $0x10] sm:$0xf] %vm861_vm3, %v1384_v32  ;;  %v638_v44 = vmul.f32 %v1820_v22, %v528_v40 }
  0xf2   : > { %882 = vst.msk [vmem:[%s1842_s15 + $0x50] sm:$0xf] %vm861_vm3, %v1400_v33  ;;  %v679_v42 = vadd.f32 %v1826_v24, %v640_v34  ;;  %v695_v43 = vadd.f32 %v1826_v24, %v656_v35  ;;  %v654_v45 = vmul.f32 %v1820_v22, %v592_v41  ;;  %v1387_v46 = vpack.c.bf16 %v708_v36, %v708_v36  ;;  %v1448_v50 = vpop.f32.mrf.mxu0  ;;  %v1464_v51 = vpop.f32.mrf.mxu1 }
  0xf3   : > { %v1403_v47 = vpack.c.bf16 %v724_v37, %v724_v37  ;;  %v706_v48 = vmax.f32 %v674_v38, 0.0  ;;  %v722_v49 = vmax.f32 %v690_v39, 0.0  ;;  %v677_v54 = vadd.f32 %v1826_v24, %v638_v44 }
  0xf4   : > { %v711_v52 = vmax.f32 %v679_v42, 0.0  ;;  %v727_v53 = vmax.f32 %v695_v43, 0.0  ;;  %v693_v55 = vadd.f32 %v1826_v24, %v654_v45  ;;  %869 = vst.msk [vmem:[%s1842_s15 + $0x1c] sm:$0xf] %vm861_vm3, %v1387_v46  ;;  %v641_v58 = vmul.f32 %v1448_v50, %v1820_v22  ;;  %v531_v60 = vpop.f32.mrf.mxu0  ;;  %v595_v61 = vpop.f32.mrf.mxu1 }
  0xf5   : > { %885 = vst.msk [vmem:[%s1842_s15 + $0x5c] sm:$0xf] %vm861_vm3, %v1403_v47  ;;  %v1385_v56 = vpack.c.bf16 %v706_v48, %v706_v48  ;;  %v1401_v57 = vpack.c.bf16 %v722_v49, %v722_v49  ;;  %v657_v59 = vmul.f32 %v1464_v51, %v1820_v22  ;;  %v709_v0 = vmax.f32 %v677_v54, 0.0 }
  0xf6   : > { %v1390_v62 = vpack.c.bf16 %v711_v52, %v711_v52  ;;  %v1406_v63 = vpack.c.bf16 %v727_v53, %v727_v53  ;;  %v725_v1 = vmax.f32 %v693_v55, 0.0  ;;  %v680_v2 = vadd.f32 %v1826_v24, %v641_v58  ;;  %v1451_v6 = vpop.f32.mrf.mxu0  ;;  %v1467_v7 = vpop.f32.mrf.mxu1 }
  0xf7   : > { %867 = vst.msk [vmem:[%s1842_s15 + $0x14] sm:$0xf] %vm861_vm3, %v1385_v56  ;;  %883 = vst.msk [vmem:[%s1842_s15 + $0x54] sm:$0xf] %vm861_vm3, %v1401_v57  ;;  %v696_v3 = vadd.f32 %v1826_v24, %v657_v59  ;;  %v639_v4 = vmul.f32 %v1820_v22, %v531_v60  ;;  %v655_v5 = vmul.f32 %v1820_v22, %v595_v61 }
  0xf8   : > { %872 = vst.msk [vmem:[%s1842_s15 + $0x28] sm:$0xf] %vm861_vm3, %v1390_v62  ;;  %888 = vst.msk [vmem:[%s1842_s15 + $0x68] sm:$0xf] %vm861_vm3, %v1406_v63  ;;  %v1388_v8 = vpack.c.bf16 %v709_v0, %v709_v0  ;;  %v1404_v9 = vpack.c.bf16 %v725_v1, %v725_v1  ;;  %v644_v10 = vmul.f32 %v1451_v6, %v1820_v22  ;;  %v712_v12 = vmax.f32 %v680_v2, 0.0  ;;  %v544_v16 = vpop.f32.mrf.mxu0  ;;  %v608_v17 = vpop.f32.mrf.mxu1 }
  0xf9   : > { %v660_v11 = vmul.f32 %v1467_v7, %v1820_v22  ;;  %v728_v13 = vmax.f32 %v696_v3, 0.0  ;;  %v678_v14 = vadd.f32 %v1826_v24, %v639_v4  ;;  %v694_v15 = vadd.f32 %v1826_v24, %v655_v5 }
  0xfa   : > { %870 = vst.msk [vmem:[%s1842_s15 + $0x20] sm:$0xf] %vm861_vm3, %v1388_v8  ;;  %886 = vst.msk [vmem:[%s1842_s15 + $0x60] sm:$0xf] %vm861_vm3, %v1404_v9  ;;  %v683_v18 = vadd.f32 %v1826_v24, %v644_v10  ;;  %v642_v20 = vmul.f32 %v1820_v22, %v544_v16  ;;  %v658_v21 = vmul.f32 %v1820_v22, %v608_v17  ;;  %v1452_v28 = vpop.f32.mrf.mxu0  ;;  %v1468_v29 = vpop.f32.mrf.mxu1 }
  0xfb   : > { %v699_v19 = vadd.f32 %v1826_v24, %v660_v11  ;;  %v1391_v23 = vpack.c.bf16 %v712_v12, %v712_v12  ;;  %v1407_v25 = vpack.c.bf16 %v728_v13, %v728_v13  ;;  %v710_v26 = vmax.f32 %v678_v14, 0.0 }
  0xfc   : > { %v726_v27 = vmax.f32 %v694_v15, 0.0  ;;  %v715_v30 = vmax.f32 %v683_v18, 0.0  ;;  %v681_v32 = vadd.f32 %v1826_v24, %v642_v20  ;;  %v697_v33 = vadd.f32 %v1826_v24, %v658_v21  ;;  %v547_v38 = vpop.f32.mrf.mxu0  ;;  %v611_v39 = vpop.f32.mrf.mxu1 }
  0xfd   : > { %v731_v31 = vmax.f32 %v699_v19, 0.0  ;;  %873 = vst.msk [vmem:[%s1842_s15 + $0x2c] sm:$0xf] %vm861_vm3, %v1391_v23  ;;  %889 = vst.msk [vmem:[%s1842_s15 + $0x6c] sm:$0xf] %vm861_vm3, %v1407_v25  ;;  %v1389_v34 = vpack.c.bf16 %v710_v26, %v710_v26  ;;  %v645_v36 = vmul.f32 %v1452_v28, %v1820_v22  ;;  %v661_v37 = vmul.f32 %v1468_v29, %v1820_v22 }
  0xfe   : > { %v1405_v35 = vpack.c.bf16 %v726_v27, %v726_v27  ;;  %v1394_v40 = vpack.c.bf16 %v715_v30, %v715_v30  ;;  %v713_v42 = vmax.f32 %v681_v32, 0.0  ;;  %v729_v43 = vmax.f32 %v697_v33, 0.0 }
  0xff   : > { %v1410_v41 = vpack.c.bf16 %v731_v31, %v731_v31  ;;  %871 = vst.msk [vmem:[%s1842_s15 + $0x24] sm:$0xf] %vm861_vm3, %v1389_v34  ;;  %v684_v44 = vadd.f32 %v1826_v24, %v645_v36  ;;  %v700_v45 = vadd.f32 %v1826_v24, %v661_v37  ;;  %v643_v46 = vmul.f32 %v1820_v22, %v547_v38 }
 0x100   : > { %887 = vst.msk [vmem:[%s1842_s15 + $0x64] sm:$0xf] %vm861_vm3, %v1405_v35  ;;  %v659_v47 = vmul.f32 %v1820_v22, %v611_v39  ;;  %876 = vst.msk [vmem:[%s1842_s15 + $0x38] sm:$0xf] %vm861_vm3, %v1394_v40  ;;  %v1392_v48 = vpack.c.bf16 %v713_v42, %v713_v42  ;;  %v1408_v49 = vpack.c.bf16 %v729_v43, %v729_v43 }
 0x101   : > { %892 = vst.msk [vmem:[%s1842_s15 + $0x78] sm:$0xf] %vm861_vm3, %v1410_v41  ;;  %v716_v50 = vmax.f32 %v684_v44, 0.0  ;;  %v732_v51 = vmax.f32 %v700_v45, 0.0  ;;  %v682_v52 = vadd.f32 %v1826_v24, %v643_v46 }
 0x102   : > { %v698_v53 = vadd.f32 %v1826_v24, %v659_v47  ;;  %874 = vst.msk [vmem:[%s1842_s15 + $0x30] sm:$0xf] %vm861_vm3, %v1392_v48  ;;  %890 = vst.msk [vmem:[%s1842_s15 + $0x70] sm:$0xf] %vm861_vm3, %v1408_v49 }
 0x103   : > { %v1395_v22 = vpack.c.bf16 %v716_v50, %v716_v50  ;;  %v1411_v54 = vpack.c.bf16 %v732_v51, %v732_v51  ;;  %v714_v55 = vmax.f32 %v682_v52, 0.0 }
 0x104   : > { %v730_v56 = vmax.f32 %v698_v53, 0.0  ;;  %900 = sbr.rel (!%p1758_p3) target bundleno = 325 (0x145), region = 40 }
 0x105   : > { %877 = vst.msk [vmem:[%s1842_s15 + $0x3c] sm:$0xf] %vm861_vm3, %v1395_v22  ;;  %893 = vst.msk [vmem:[%s1842_s15 + $0x7c] sm:$0xf] %vm861_vm3, %v1411_v54  ;;  %v1393_v57 = vpack.c.bf16 %v714_v55, %v714_v55 }
 0x106   : > { %v1409_v58 = vpack.c.bf16 %v730_v56, %v730_v56 }
 0x107   : > { %875 = vst.msk [vmem:[%s1842_s15 + $0x34] sm:$0xf] %vm861_vm3, %v1393_v57 }
 0x108   : > { %891 = vst.msk [vmem:[%s1842_s15 + $0x74] sm:$0xf] %vm861_vm3, %v1409_v58 }
 0x109   : > { %s2114_s22 = smov (!%p903_p9, %s902_s22), 32 }
 0x10a   : > { %s1365_s30 = sshll.u32 %s2114_s22, 6 }
 0x10b   : > { %p1368_p10 = scmp.eq.s32.totalorder %s1365_s30, 0 }
 0x10c   : > { %s1971_s5 = sshrl.u32 (!%p1368_p10), %s2114_s22, 5 }
 0x10d   : > { %912 = sbr.rel (%p1368_p10) target bundleno = 325 (0x145), region = 44  ;;  %p1369_p11 = scmp.le.s32.totalorder (!%p1368_p10), %s1971_s5, 0 }
 0x112   : > { %1205 = sbr.rel (%p1369_p11) target bundleno = 308 (0x134), region = 125  ;;  %s2104_s17 = smov (!%p1369_p11), %s1965_s29 }
 0x113   : > { %s2105_s23 = smov (!%p1369_p11), %s1842_s15  ;;  %s1980_s28 = smov (!%p1369_p11), 0  }
 0x114   : > { %s1982_s6 = smov (!%p1369_p11), 0  }
 0x117 LB: >> { %v929_v24 = vld [vmem:[%s1674_s23] sm:$0xf]  ;;  %v931_v59 = vld [vmem:[%s1674_s23 + $0x4] sm:$0xf]  ;;  %v933_v60 = vld [vmem:[%s1674_s23 + $0x8] sm:$0xf]  ;;  %s1682_s6 = sphi %s1982_s6, %s923_s6   ;;  %s1678_s28 = sphi %s1980_s28, %s2106_s28   ;;  %s1674_s23 = sphi %s2105_s23, %s998_s23   ;;  %s1670_s17 = sphi %s2104_s17, %s999_s17  }
 0x118   : >> { %930 = vst [vmem:[%s1670_s17] sm:$0xf] %v929_v24  ;;  %932 = vst [vmem:[%s1670_s17 + $0x4] sm:$0xf] %v931_v59  ;;  %v935_v61 = vld [vmem:[%s1674_s23 + $0xc] sm:$0xf]  ;;  %s993_s7 = sadd.s32 1, %s1678_s28 }
 0x119   : >> { %934 = vst [vmem:[%s1670_s17 + $0x8] sm:$0xf] %v933_v60  ;;  %v937_v62 = vld [vmem:[%s1674_s23 + $0x10] sm:$0xf]  ;;  %v939_v63 = vld [vmem:[%s1674_s23 + $0x14] sm:$0xf]  ;;  %p994_p12 = scmp.ge.s32.totalorder %s993_s7, %s1971_s5 }
 0x11a   : >> { %936 = vst [vmem:[%s1670_s17 + $0xc] sm:$0xf] %v935_v61  ;;  %938 = vst [vmem:[%s1670_s17 + $0x10] sm:$0xf] %v937_v62  ;;  %v941_v0 = vld [vmem:[%s1674_s23 + $0x18] sm:$0xf] }
 0x11b   : >> { %940 = vst [vmem:[%s1670_s17 + $0x14] sm:$0xf] %v939_v63  ;;  %v943_v1 = vld [vmem:[%s1674_s23 + $0x1c] sm:$0xf]  ;;  %v945_v2 = vld [vmem:[%s1674_s23 + $0x20] sm:$0xf] }
 0x11c   : >> { %942 = vst [vmem:[%s1670_s17 + $0x18] sm:$0xf] %v941_v0  ;;  %944 = vst [vmem:[%s1670_s17 + $0x1c] sm:$0xf] %v943_v1  ;;  %v947_v3 = vld [vmem:[%s1674_s23 + $0x24] sm:$0xf] }
 0x11d   : >> { %946 = vst [vmem:[%s1670_s17 + $0x20] sm:$0xf] %v945_v2  ;;  %v949_v4 = vld [vmem:[%s1674_s23 + $0x28] sm:$0xf]  ;;  %v951_v5 = vld [vmem:[%s1674_s23 + $0x2c] sm:$0xf] }
 0x11e   : >> { %948 = vst [vmem:[%s1670_s17 + $0x24] sm:$0xf] %v947_v3  ;;  %950 = vst [vmem:[%s1670_s17 + $0x28] sm:$0xf] %v949_v4  ;;  %v953_v6 = vld [vmem:[%s1674_s23 + $0x30] sm:$0xf] }
 0x11f   : >> { %952 = vst [vmem:[%s1670_s17 + $0x2c] sm:$0xf] %v951_v5  ;;  %v955_v7 = vld [vmem:[%s1674_s23 + $0x34] sm:$0xf]  ;;  %v957_v8 = vld [vmem:[%s1674_s23 + $0x38] sm:$0xf] }
 0x120   : >> { %954 = vst [vmem:[%s1670_s17 + $0x30] sm:$0xf] %v953_v6  ;;  %956 = vst [vmem:[%s1670_s17 + $0x34] sm:$0xf] %v955_v7  ;;  %v959_v9 = vld [vmem:[%s1674_s23 + $0x3c] sm:$0xf] }
 0x121   : >> { %958 = vst [vmem:[%s1670_s17 + $0x38] sm:$0xf] %v957_v8  ;;  %v961_v10 = vld [vmem:[%s1674_s23 + $0x40] sm:$0xf]  ;;  %v963_v11 = vld [vmem:[%s1674_s23 + $0x44] sm:$0xf] }
 0x122   : >> { %960 = vst [vmem:[%s1670_s17 + $0x3c] sm:$0xf] %v959_v9  ;;  %962 = vst [vmem:[%s1670_s17 + $0x40] sm:$0xf] %v961_v10  ;;  %v965_v12 = vld [vmem:[%s1674_s23 + $0x48] sm:$0xf] }
 0x123   : >> { %964 = vst [vmem:[%s1670_s17 + $0x44] sm:$0xf] %v963_v11  ;;  %v967_v13 = vld [vmem:[%s1674_s23 + $0x4c] sm:$0xf]  ;;  %v969_v14 = vld [vmem:[%s1674_s23 + $0x50] sm:$0xf] }
 0x124   : >> { %966 = vst [vmem:[%s1670_s17 + $0x48] sm:$0xf] %v965_v12  ;;  %968 = vst [vmem:[%s1670_s17 + $0x4c] sm:$0xf] %v967_v13  ;;  %v971_v15 = vld [vmem:[%s1674_s23 + $0x54] sm:$0xf] }
 0x125   : >> { %970 = vst [vmem:[%s1670_s17 + $0x50] sm:$0xf] %v969_v14  ;;  %v973_v16 = vld [vmem:[%s1674_s23 + $0x58] sm:$0xf]  ;;  %v975_v17 = vld [vmem:[%s1674_s23 + $0x5c] sm:$0xf] }
 0x126   : >> { %972 = vst [vmem:[%s1670_s17 + $0x54] sm:$0xf] %v971_v15  ;;  %974 = vst [vmem:[%s1670_s17 + $0x58] sm:$0xf] %v973_v16  ;;  %v977_v18 = vld [vmem:[%s1674_s23 + $0x60] sm:$0xf] }
 0x127   : >> { %976 = vst [vmem:[%s1670_s17 + $0x5c] sm:$0xf] %v975_v17  ;;  %v979_v19 = vld [vmem:[%s1674_s23 + $0x64] sm:$0xf]  ;;  %v981_v20 = vld [vmem:[%s1674_s23 + $0x68] sm:$0xf] }
 0x128   : >> { %978 = vst [vmem:[%s1670_s17 + $0x60] sm:$0xf] %v977_v18  ;;  %980 = vst [vmem:[%s1670_s17 + $0x64] sm:$0xf] %v979_v19  ;;  %v983_v21 = vld [vmem:[%s1674_s23 + $0x6c] sm:$0xf] }
 0x129   : >> { %982 = vst [vmem:[%s1670_s17 + $0x68] sm:$0xf] %v981_v20  ;;  %v985_v23 = vld [vmem:[%s1674_s23 + $0x70] sm:$0xf]  ;;  %v987_v25 = vld [vmem:[%s1674_s23 + $0x74] sm:$0xf] }
 0x12a   : >> { %984 = vst [vmem:[%s1670_s17 + $0x6c] sm:$0xf] %v983_v21  ;;  %986 = vst [vmem:[%s1670_s17 + $0x70] sm:$0xf] %v985_v23  ;;  %v989_v26 = vld [vmem:[%s1674_s23 + $0x78] sm:$0xf] }
 0x12b   : >> { %988 = vst [vmem:[%s1670_s17 + $0x74] sm:$0xf] %v987_v25  ;;  %v991_v27 = vld [vmem:[%s1674_s23 + $0x7c] sm:$0xf]  ;;  %990 = vst [vmem:[%s1670_s17 + $0x78] sm:$0xf] %v989_v26 }
 0x12c   : >> { %992 = vst [vmem:[%s1670_s17 + $0x7c] sm:$0xf] %v991_v27  ;;  %s2116_s7 = smov (%p994_p12, %s993_s7), 0  ;;  %s923_s6 = sadd.s32 1, %s1682_s6  }
 0x12d   : >> { %s1370_s8 = sshll.u32 %s2116_s7, 7  ;;  %p922_p13 = scmp.ge.s32.totalorder %s923_s6, %s1971_s5 }
 0x12e   : >> { %s998_s23 = scalar_lea.vmem %s1842_s15, %s1370_s8 [#allocation2]   ;;  %s999_s17 = scalar_lea.vmem %s1965_s29, %s1370_s8  }
 0x12f   : >> { %s2106_s28 = smov %s2116_s7  ;;  %925 = sbr.rel (!%p922_p13) target bundleno = 279 (0x117), region = 131 }
 0x134 PF: > { %s2075_s9 = sand.u32 31, %s2114_s22   ;;  %s1413_s10 = sshll.u32 %s1971_s5, 7 }
 0x135   : > { %s1004_s11 = scalar_lea.vmem %s1842_s15, %s1413_s10 [#allocation2]   ;;  %s1006_s12 = scalar_lea.vmem %s1965_s29, %s1413_s10  }
 0x136   : > { %p1375_p0 = scmp.le.s32.totalorder %s2075_s9, 0 }
 0x137   : > { %s1684_s13 = smov (!%p1375_p0), %s1006_s12   ;;  %s1688_s14 = smov (!%p1375_p0), %s1004_s11  }
 0x138   : > { %1219 = sbr.rel (%p1375_p0) target bundleno = 325 (0x145), region = 136  ;;  %s1692_s20 = smov (!%p1375_p0), 0  }
 0x139   : > { %s1696_s24 = smov (!%p1375_p0), 0  }
 0x13d LB: >> { %v1016_v28 = vld [vmem:[%s1690_s14] sm:$0xf]  ;;  %s1018_s22 = sadd.s32 1, %s1694_s20  ;;  %s1010_s24 = sadd.s32 1, %s1698_s24   ;;  %s1698_s24 = sphi %s1696_s24, %s1010_s24   ;;  %s1694_s20 = sphi %s1692_s20, %s1693_s20   ;;  %s1690_s14 = sphi %s1688_s14, %s1023_s14   ;;  %s1686_s13 = sphi %s1684_s13, %s1024_s13  }
 0x13e   : >> { %1017 = vst [vmem:[%s1686_s13] sm:$0xf] %v1016_v28  ;;  %p1019_p1 = scmp.ge.s32.totalorder %s1018_s22, %s2075_s9  ;;  %p1009_p2 = scmp.ge.s32.totalorder %s1010_s24, %s2075_s9 }
 0x140   : >> { %s2118_s22 = smov (%p1019_p1, %s1018_s22), 0  ;;  %1012 = sbr.rel (!%p1009_p2) target bundleno = 317 (0x13d), region = 142 }
 0x141   : >> { %s1376_s15 = sshll.u32 %s2118_s22, 2  ;;  %s1693_s20 = smov %s2118_s22  }
 0x142   : >> { %s1023_s14 = scalar_lea.vmem %s1004_s11, %s1376_s15 [#allocation2]   ;;  %s1024_s13 = scalar_lea.vmem %s1006_s12, %s1376_s15  }
 0x145 PF: > { %s14_s19 = sadd.s32 1, %s1666_s19   ;;  %s2107_s15 = smov %s1654_s16 }
 0x146   : > { %p11_p3 = scmp.ge.s32.totalorder %s14_s19, 13   ;;  %s2108_s16 = smov %s1767_s25 }
 0x147   : > { %s2109_s17 = smov %s1662_s18  ;;  %s2110_s18 = smov %s2112_s21 }
 0x148   :  { %13 = sbr.rel (!%p11_p3) target bundleno = 3 (0x3), region = 153 }

</bundles_post_ra>
